<compile_context>
chip_gen: v6e
topology: v6e:2x2x1
jax: 0.10.0
libtpu: 0.0.40
codegen_flags: <defaults>
</compile_context>

<pallas_src>
import functools

import jax
import jax.numpy as jnp
from jax.experimental import pallas as pl
from jax.experimental.pallas import tpu as pltpu

LANES = 128
EPS = 1e-5
VMEM_LIMIT = 32 * 1024 * 1024   # scoped-VMEM budget that is safe on v5e/v6e/v7x


def _round_up(x, m):
    return (x + m - 1) // m * m


def _pick_tile_m(m, k, cpad, vmem_limit=VMEM_LIMIT):
    """Largest M tile whose double-buffered pass-2 working set fits the budget."""
    # Per-row bytes (pass 2, the heavier pass): bf16 A tile + f32 out tile,
    # both double-buffered, plus ~one f32 conv temporary inside the kernel.
    per_row = 2 * (k * 2) + 2 * (cpad * 4) + cpad * 4
    tm = int(vmem_limit * 0.6) // per_row          # headroom for weights/sems
    tm = max(256, min(tm, 2048))                   # 1024+ rows ~86% HBM roofline
    tm = (tm // 256) * 256
    return min(tm, _round_up(m, 256))              # don't tile wider than the problem


# ---------- pass 1: conv-as-matmul (bf16 -> f32 acc) -> per-tile partial stats

def conv_stats_kernel(a_ref, w_ref, stats_ref):
    conv = jnp.dot(a_ref[...], w_ref[...], preferred_element_type=jnp.float32)
    # Disjoint per-tile partial sums (row 0 = sum, row 1 = sum of squares,
    # rows 2..7 zero-padding so the block stays 8-sublane aligned).  Zero-padded
    # A rows contribute 0, so dividing by the true M on the host is exact.
    stats_ref[0:1, :] = jnp.sum(conv, axis=0, keepdims=True)
    stats_ref[1:2, :] = jnp.sum(conv * conv, axis=0, keepdims=True)
    stats_ref[2:, :] = jnp.zeros(
        (stats_ref.shape[0] - 2, stats_ref.shape[1]), jnp.float32)


# ---------- pass 2: recompute matmul, normalize (precomputed scale/shift), ReLU

def conv_bn_relu_kernel(a_ref, w_ref, scale_ref, shift_ref, o_ref):
    conv = jnp.dot(a_ref[...], w_ref[...], preferred_element_type=jnp.float32)
    o_ref[...] = jnp.maximum(conv * scale_ref[...] + shift_ref[...], 0.0)


@functools.partial(jax.jit, static_argnames=("stride", "padding"))
def encoder_forward(x, weight, gamma, beta, stride=(2, 1), padding=(1, 1)):
    """x: [B, Cin, H, W] NCHW, weight: [Cout, Cin, KH, KW] (no bias)."""
    B, Cin, H, W = x.shape
    Cout, _, KH, KW = weight.shape
    sh, sw = stride
    ph, pw = padding
    Ho = (H + 2 * ph - KH) // sh + 1
    Wo = (W + 2 * pw - KW) // sw + 1

    M = B * Ho * Wo
    K = Cin * KH * KW
    Cpad = _round_up(Cout, LANES)                  # lane-dense output
    TM = _pick_tile_m(M, K, Cpad)
    M_pad = _round_up(M, TM)
    G = M_pad // TM

    # ---- glue: im2col (bf16 FIRST so the stack/transpose/reshape are half width)
    # TODO(synk): fuse im2col into the kernels (9 shifted (TM,Cin)x(Cin,Cout)
    # matmuls over padded NHWC input) to remove the KH*KW patch-matrix blowup.
    x_pad = jnp.pad(x, ((0, 0), (0, 0), (ph, ph), (pw, pw))).astype(jnp.bfloat16)
    patches = []
    for kh in range(KH):
        for kw in range(KW):
            patches.append(x_pad[:, :, kh:kh + sh * Ho:sh, kw:kw + sw * Wo:sw])
    patches = jnp.stack(patches, axis=2)                    # [B, Cin, KH*KW, Ho, Wo]
    A = patches.transpose(0, 3, 4, 1, 2).reshape(M, K)      # rows (b,ho,wo), cols (ci,kh,kw)
    A = jnp.pad(A, ((0, M_pad - M), (0, 0)))

    Wmat = weight.reshape(Cout, K).T.astype(jnp.bfloat16)   # [K, Cout]
    Wmat = jnp.pad(Wmat, ((0, 0), (0, Cpad - Cout)))

    gamma_p = jnp.pad(gamma.astype(jnp.float32), (0, Cpad - Cout)).reshape(1, Cpad)
    beta_p = jnp.pad(beta.astype(jnp.float32), (0, Cpad - Cout)).reshape(1, Cpad)

    grid = (G,)

    # ---- pass 1: bf16 matmul -> per-tile partial sum/sumsq (no conv writeback)
    stats = pl.pallas_call(
        conv_stats_kernel,
        out_shape=jax.ShapeDtypeStruct((8 * G, Cpad), jnp.float32),
        grid=grid,
        in_specs=[
            pl.BlockSpec((TM, K), lambda i: (i, 0)),
            pl.BlockSpec((K, Cpad), lambda i: (0, 0)),
        ],
        out_specs=pl.BlockSpec((8, Cpad), lambda i: (i, 0)),
        compiler_params=pltpu.CompilerParams(
            dimension_semantics=("parallel",),          # no resident accumulator
            vmem_limit_bytes=VMEM_LIMIT),
        cost_estimate=pl.CostEstimate(
            flops=2 * M_pad * K * Cpad + 3 * M_pad * Cpad,
            transcendentals=0,
            bytes_accessed=M_pad * K * 2 + K * Cpad * 2 + 8 * G * Cpad * 4),
    )(A, Wmat)

    # ---- tiny per-channel finalize: reduce G partials, batch stats -> scale/shift
    stats = stats.reshape(G, 8, Cpad)
    csum = jnp.sum(stats[:, 0, :], axis=0, keepdims=True)
    csumsq = jnp.sum(stats[:, 1, :], axis=0, keepdims=True)
    mean = csum / M                                       # divide by TRUE M
    var = jnp.maximum(csumsq / M - mean * mean, 0.0)      # clamp cancellation
    scale = gamma_p * jax.lax.rsqrt(var + EPS)
    shift = beta_p - mean * scale

    # ---- pass 2: recompute the matmul from the bf16 A tile, normalize + ReLU
    out_pad = pl.pallas_call(
        conv_bn_relu_kernel,
        out_shape=jax.ShapeDtypeStruct((M_pad, Cpad), jnp.float32),
        grid=grid,
        in_specs=[
            pl.BlockSpec((TM, K), lambda i: (i, 0)),
            pl.BlockSpec((K, Cpad), lambda i: (0, 0)),
            pl.BlockSpec((1, Cpad), lambda i: (0, 0)),
            pl.BlockSpec((1, Cpad), lambda i: (0, 0)),
        ],
        out_specs=pl.BlockSpec((TM, Cpad), lambda i: (i, 0)),
        compiler_params=pltpu.CompilerParams(
            dimension_semantics=("parallel",),
            vmem_limit_bytes=VMEM_LIMIT),
        cost_estimate=pl.CostEstimate(
            flops=2 * M_pad * K * Cpad + 3 * M_pad * Cpad,
            transcendentals=0,
            bytes_accessed=M_pad * K * 2 + K * Cpad * 2 + 2 * Cpad * 4
                           + M_pad * Cpad * 4),
    )(A, Wmat, scale, shift)

    # ---- glue: drop padded rows/channels, back to NCHW (module contract).
    # TODO(synk): return NHWC directly when the consumer accepts it (saves one
    # full read+write of the output and keeps the final store lane-dense).
    return out_pad[:M, :Cout].reshape(B, Ho, Wo, Cout).transpose(0, 3, 1, 2)


def reference_forward(x, weight, gamma, beta, stride=(2, 1), padding=(1, 1),
                      matmul_dtype=jnp.float32):
    """Pure-JAX reference of the PyTorch module (optionally bf16 conv operands)."""
    conv = jax.lax.conv_general_dilated(
        x.astype(matmul_dtype), weight.astype(matmul_dtype),
        window_strides=stride, padding=[padding, padding],
        dimension_numbers=("NCHW", "OIHW", "NCHW"),
        preferred_element_type=jnp.float32)
    mean = jnp.mean(conv, axis=(0, 2, 3), keepdims=True)
    var = jnp.mean((conv - mean) ** 2, axis=(0, 2, 3), keepdims=True)
    y = gamma.reshape(1, -1, 1, 1) * (conv - mean) * jax.lax.rsqrt(var + EPS) \
        + beta.reshape(1, -1, 1, 1)
    return jnp.maximum(y, 0.0)


if __name__ == "__main__":
    B, Cin, H, W = 2, 4, 16, 16
    Cout, KH, KW = 8, 3, 3

    key = jax.random.PRNGKey(0)
    kx, kw = jax.random.split(key)
    x = jax.random.normal(kx, (B, Cin, H, W), dtype=jnp.float32)
    weight = jax.random.normal(kw, (Cout, Cin, KH, KW), dtype=jnp.float32) * 0.1
    gamma = jnp.ones((Cout,), jnp.float32)   # BatchNorm2d default affine
    beta = jnp.zeros((Cout,), jnp.float32)

    out = jax.block_until_ready(encoder_forward(x, weight, gamma, beta))
    assert out.shape == (B, Cout, H // 2, W), out.shape

    # Matched-precision check (bf16 conv operands, f32 accumulation + BN).
    ref_bf16 = jax.block_until_ready(
        reference_forward(x, weight, gamma, beta, matmul_dtype=jnp.bfloat16))
    assert jnp.allclose(out, ref_bf16, atol=5e-3, rtol=5e-3), \
        float(jnp.max(jnp.abs(out - ref_bf16)))

    # Looser sanity check against the full-f32 PyTorch-equivalent reference
    # (the kernel feeds bf16 operands to the MXU).
    ref_f32 = jax.block_until_ready(reference_forward(x, weight, gamma, beta))
    assert jnp.allclose(out, ref_f32, atol=5e-2, rtol=5e-2), \
        float(jnp.max(jnp.abs(out - ref_f32)))

    print("KERNEL_OK")
</pallas_src>

<mosaic_0001>
module attributes {stable_mosaic.version = 11 : i64} {
  func.func @conv_bn_relu_kernel(%arg0: i32, %arg1: memref<256x36xbf16, #tpu.memory_space<vmem>>, %arg2: memref<36x128xbf16, #tpu.memory_space<vmem>>, %arg3: memref<1x128xf32, #tpu.memory_space<vmem>>, %arg4: memref<1x128xf32, #tpu.memory_space<vmem>>, %arg5: memref<256x128xf32, #tpu.memory_space<vmem>>) attributes {dimension_semantics = [#tpu.dimension_semantics<parallel>], iteration_bounds = array<i64: 1>, scalar_prefetch = 0 : i64, scratch_operands = 0 : i64, tpu.core_type = #tpu.core_type<tc>, window_params = [{transform_indices = @transform_0, window_bounds = array<i64: 256, 36>}, {pipeline_mode = #tpu.pipeline_mode<synchronous>, transform_indices = @transform_1, window_bounds = array<i64: 36, 128>}, {pipeline_mode = #tpu.pipeline_mode<synchronous>, transform_indices = @transform_2, window_bounds = array<i64: 1, 128>}, {pipeline_mode = #tpu.pipeline_mode<synchronous>, transform_indices = @transform_3, window_bounds = array<i64: 1, 128>}, {transform_indices = @transform_4, window_bounds = array<i64: 256, 128>}]} {
    %c0 = arith.constant 0 : index
    %c0_0 = arith.constant 0 : index
    %0 = vector.load %arg1[%c0, %c0_0] : memref<256x36xbf16, #tpu.memory_space<vmem>>, vector<256x36xbf16>
    %c0_1 = arith.constant 0 : index
    %c0_2 = arith.constant 0 : index
    %1 = vector.load %arg2[%c0_1, %c0_2] : memref<36x128xbf16, #tpu.memory_space<vmem>>, vector<36x128xbf16>
    %cst = arith.constant dense<0.000000e+00> : vector<256x128xf32>
    %2 = tpu.matmul %0, %1, %cst {dimension_numbers = #tpu.dot_dimension_numbers<[1], [0], [0], [1], [0, 0, 1, 1], [], []>} : vector<256x36xbf16>, vector<36x128xbf16>, vector<256x128xf32> -> vector<256x128xf32>
    %c0_3 = arith.constant 0 : index
    %c0_4 = arith.constant 0 : index
    %3 = vector.load %arg3[%c0_3, %c0_4] : memref<1x128xf32, #tpu.memory_space<vmem>>, vector<1x128xf32>
    %4 = vector.broadcast %3 : vector<1x128xf32> to vector<256x128xf32>
    %5 = arith.mulf %2, %4 : vector<256x128xf32>
    %c0_5 = arith.constant 0 : index
    %c0_6 = arith.constant 0 : index
    %6 = vector.load %arg4[%c0_5, %c0_6] : memref<1x128xf32, #tpu.memory_space<vmem>>, vector<1x128xf32>
    %7 = vector.broadcast %6 : vector<1x128xf32> to vector<256x128xf32>
    %8 = arith.addf %5, %7 : vector<256x128xf32>
    %cst_7 = arith.constant 0.000000e+00 : f32
    %9 = vector.broadcast %cst_7 : f32 to vector<256x128xf32>
    %10 = arith.maximumf %8, %9 : vector<256x128xf32>
    %c0_8 = arith.constant 0 : index
    %c0_9 = arith.constant 0 : index
    %11 = vector.load %arg5[%c0_8, %c0_9] : memref<256x128xf32, #tpu.memory_space<vmem>>, vector<256x128xf32>
    tpu.vector_store %arg5[%c0_8, %c0_9], %10 {strides = array<i32>} : memref<256x128xf32, #tpu.memory_space<vmem>>, vector<256x128xf32>,
    return
  }
  func.func @transform_0(%arg0: i32) -> (i32, i32) {
    %c0_i32 = arith.constant 0 : i32
    %c0_i32_0 = arith.constant 0 : i32
    return %arg0, %c0_i32 : i32, i32
  }
  func.func @transform_1(%arg0: i32) -> (i32, i32) {
    %c0_i32 = arith.constant 0 : i32
    %c0_i32_0 = arith.constant 0 : i32
    %c0_i32_1 = arith.constant 0 : i32
    return %c0_i32, %c0_i32_0 : i32, i32
  }
  func.func @transform_2(%arg0: i32) -> (i32, i32) {
    %c0_i32 = arith.constant 0 : i32
    %c0_i32_0 = arith.constant 0 : i32
    %c0_i32_1 = arith.constant 0 : i32
    return %c0_i32, %c0_i32_0 : i32, i32
  }
  func.func @transform_3(%arg0: i32) -> (i32, i32) {
    %c0_i32 = arith.constant 0 : i32
    %c0_i32_0 = arith.constant 0 : i32
    %c0_i32_1 = arith.constant 0 : i32
    return %c0_i32, %c0_i32_0 : i32, i32
  }
  func.func @transform_4(%arg0: i32) -> (i32, i32) {
    %c0_i32 = arith.constant 0 : i32
    %c0_i32_0 = arith.constant 0 : i32
    return %arg0, %c0_i32 : i32, i32
  }
}

module attributes {stable_mosaic.version = 11 : i64} {
  func.func @conv_stats_kernel(%arg0: i32, %arg1: memref<256x36xbf16, #tpu.memory_space<vmem>>, %arg2: memref<36x128xbf16, #tpu.memory_space<vmem>>, %arg3: memref<8x128xf32, #tpu.memory_space<vmem>>) attributes {dimension_semantics = [#tpu.dimension_semantics<parallel>], iteration_bounds = array<i64: 1>, scalar_prefetch = 0 : i64, scratch_operands = 0 : i64, tpu.core_type = #tpu.core_type<tc>, window_params = [{transform_indices = @transform_0, window_bounds = array<i64: 256, 36>}, {pipeline_mode = #tpu.pipeline_mode<synchronous>, transform_indices = @transform_1, window_bounds = array<i64: 36, 128>}, {transform_indices = @transform_2, window_bounds = array<i64: 8, 128>}]} {
    %c0 = arith.constant 0 : index
    %c0_0 = arith.constant 0 : index
    %0 = vector.load %arg1[%c0, %c0_0] : memref<256x36xbf16, #tpu.memory_space<vmem>>, vector<256x36xbf16>
    %c0_1 = arith.constant 0 : index
    %c0_2 = arith.constant 0 : index
    %1 = vector.load %arg2[%c0_1, %c0_2] : memref<36x128xbf16, #tpu.memory_space<vmem>>, vector<36x128xbf16>
    %cst = arith.constant dense<0.000000e+00> : vector<256x128xf32>
    %2 = tpu.matmul %0, %1, %cst {dimension_numbers = #tpu.dot_dimension_numbers<[1], [0], [0], [1], [0, 0, 1, 1], [], []>} : vector<256x36xbf16>, vector<36x128xbf16>, vector<256x128xf32> -> vector<256x128xf32>
    %cst_3 = arith.constant dense<0.000000e+00> : vector<128xf32>
    %3 = vector.multi_reduction <add>, %2, %cst_3 [0] : vector<256x128xf32> to vector<128xf32>
    %4 = vector.shape_cast %3 : vector<128xf32> to vector<1x128xf32>
    %c0_4 = arith.constant 0 : index
    %c0_5 = arith.constant 0 : index
    %5 = vector.load %arg3[%c0_4, %c0_5] : memref<8x128xf32, #tpu.memory_space<vmem>>, vector<1x128xf32>
    tpu.vector_store %arg3[%c0_4, %c0_5], %4 {strides = array<i32>} : memref<8x128xf32, #tpu.memory_space<vmem>>, vector<1x128xf32>,
    %6 = arith.mulf %2, %2 : vector<256x128xf32>
    %cst_6 = arith.constant dense<0.000000e+00> : vector<128xf32>
    %7 = vector.multi_reduction <add>, %6, %cst_6 [0] : vector<256x128xf32> to vector<128xf32>
    %8 = vector.shape_cast %7 : vector<128xf32> to vector<1x128xf32>
    %c1 = arith.constant 1 : index
    %c0_7 = arith.constant 0 : index
    %9 = vector.load %arg3[%c1, %c0_7] : memref<8x128xf32, #tpu.memory_space<vmem>>, vector<1x128xf32>
    tpu.vector_store %arg3[%c1, %c0_7], %8 {strides = array<i32>} : memref<8x128xf32, #tpu.memory_space<vmem>>, vector<1x128xf32>,
    %cst_8 = arith.constant 0.000000e+00 : f32
    %10 = vector.broadcast %cst_8 : f32 to vector<6x128xf32>
    %c2 = arith.constant 2 : index
    %c0_9 = arith.constant 0 : index
    %11 = vector.load %arg3[%c2, %c0_9] : memref<8x128xf32, #tpu.memory_space<vmem>>, vector<6x128xf32>
    tpu.vector_store %arg3[%c2, %c0_9], %10 {strides = array<i32>} : memref<8x128xf32, #tpu.memory_space<vmem>>, vector<6x128xf32>,
    return
  }
  func.func @transform_0(%arg0: i32) -> (i32, i32) {
    %c0_i32 = arith.constant 0 : i32
    %c0_i32_0 = arith.constant 0 : i32
    return %arg0, %c0_i32 : i32, i32
  }
  func.func @transform_1(%arg0: i32) -> (i32, i32) {
    %c0_i32 = arith.constant 0 : i32
    %c0_i32_0 = arith.constant 0 : i32
    %c0_i32_1 = arith.constant 0 : i32
    return %c0_i32, %c0_i32_0 : i32, i32
  }
  func.func @transform_2(%arg0: i32) -> (i32, i32) {
    %c0_i32 = arith.constant 0 : i32
    %c0_i32_0 = arith.constant 0 : i32
    return %arg0, %c0_i32 : i32, i32
  }
}

</mosaic_0001>

<bundles_post_ra>
// kernel: encoder_forward.3
= control target key start
LH: loop header
LB: loop body
LE: loop exit
PB: predicated region body
PF: predicated region fallthrough
CT: control target
= control target key end

     0   :  { %vm199_vm0 = vcmask 1041408   ;;  %vm150_vm1 = vcmask 293888   ;;  %s899_s1 = inlined_call_operand.vmem [shape: bf16[36,128], index: 1, kind: input, shape index: {}]   ;;  %s900_s0 = inlined_call_operand.vmem [shape: bf16[256,36], index: 0, kind: input, shape index: {}]   ;;  %s901_s2 = inlined_call_operand.vmem [shape: f32[1,128], index: 2, kind: input, shape index: {}]   ;;  %s902_s3 = inlined_call_operand.vmem [shape: f32[1,128], index: 3, kind: input, shape index: {}]   ;;  %s903_s4 = inlined_call_operand.vmem [shape: f32[256,128], index: 4, kind: output, shape index: {}]  }
   0x1   :  { %v612_v0 = vld [vmem:[%s899_s1 + $0x10] ss:$0 sps:$4 sm:$0x33]   ;;  %v613_v1 = vld [vmem:[%s899_s1 + $0x8] sm:$0xff]   ;;  %v614_v3 = vld [vmem:[%s899_s1] sm:$0xff]  }
   0x2   :  { %610 = vmatprep.subr.msk.bf16.mxu0 %vm199_vm0, %v612_v0  ;;  %611 = vmatprep.subr.msk.bf16.mxu1 %vm199_vm0, %v612_v0  ;;  %v201_v2 = vsel %vm199_vm0, %v612_v0, 0  ;;  %v615_v4 = vld [vmem:[%s900_s0] sm:$0xff]   ;;  %v617_v6 = vld [vmem:[%s900_s0 + $0x8] sm:$0xff]   ;;  %v619_v8 = vld [vmem:[%s900_s0 + $0x10] sm:$0xff]  }
   0x3   :  { %567 = vmatpush3.bf16.msra.mxu0 %v201_v2  ;;  %607 = vmatpush3.bf16.msra.mxu1 %v201_v2  ;;  %v616_v5 = vld [vmem:[%s900_s0 + $0x40] sm:$0xff]   ;;  %v618_v7 = vld [vmem:[%s900_s0 + $0x48] sm:$0xff]   ;;  %v620_v9 = vld [vmem:[%s900_s0 + $0x50] sm:$0xff]  }
   0x4   :  { %568 = vmatprep.subr.bf16.mxu0 %v613_v1  ;;  %605 = vmatprep.subr.bf16.mxu1 %v613_v1  ;;  %v621_v10 = vld [vmem:[%s900_s0 + $0x18] sm:$0xff]   ;;  %v623_v12 = vld [vmem:[%s900_s0 + $0x20] sm:$0xff]   ;;  %v625_v14 = vld [vmem:[%s900_s0 + $0x28] sm:$0xff]  }
   0x5   :  { %572 = vmatprep.mubr.msk.bf16.mxu0 %vm150_vm1, %v615_v4  ;;  %588 = vmatprep.mubr.msk.bf16.mxu1 %vm150_vm1, %v616_v5  ;;  %v622_v11 = vld [vmem:[%s900_s0 + $0x58] sm:$0xff]   ;;  %v624_v13 = vld [vmem:[%s900_s0 + $0x60] sm:$0xff]   ;;  %v626_v15 = vld [vmem:[%s900_s0 + $0x68] sm:$0xff]  }
   0x6   :  { %v627_v16 = vld [vmem:[%s900_s0 + $0x30] sm:$0xff]   ;;  %v629_v18 = vld [vmem:[%s900_s0 + $0x38] sm:$0xff]   ;;  %v732_v20 = vld [vmem:[%s901_s2] ss:$0 sm:$0xff] }
   0x7   :  { %569 = vmatpush3.bf16.msra.mxu0 %v613_v1  ;;  %608 = vmatpush3.bf16.msra.mxu1 %v613_v1  ;;  %v628_v17 = vld [vmem:[%s900_s0 + $0x70] sm:$0xff]   ;;  %v630_v19 = vld [vmem:[%s900_s0 + $0x78] sm:$0xff]   ;;  %v737_v22 = vld [vmem:[%s902_s3] ss:$0 sm:$0xff] }
   0x8   :  { %570 = vmatprep.subr.bf16.mxu0 %v614_v3  ;;  %606 = vmatprep.subr.bf16.mxu1 %v614_v3 }
   0xb   :  { %571 = vmatpush3.bf16.msra.mxu0 %v614_v3  ;;  %609 = vmatpush3.bf16.msra.mxu1 %v614_v3 }
   0xe   :  { %573 = vmatmul.mubr.msk.bf16.vlgmr.msra.gmra.mxu0 %vm150_vm1, %v617_v6  ;;  %589 = vmatmul.mubr.msk.bf16.vlgmr.msra.gmra.mxu1 %vm150_vm1, %v618_v7 }
   0xf   :  { %576 = vmatprep.mubr.msk.bf16.mxu0 %vm150_vm1, %v619_v8  ;;  %592 = vmatprep.mubr.msk.bf16.mxu1 %vm150_vm1, %v620_v9 }
  0x16   :  { %577 = vmatmul.mubr.msk.bf16.gmra.mxu0 %vm150_vm1, %v621_v10  ;;  %593 = vmatmul.mubr.msk.bf16.gmra.mxu1 %vm150_vm1, %v622_v11 }
  0x17   :  { %580 = vmatprep.mubr.msk.bf16.mxu0 %vm150_vm1, %v623_v12  ;;  %596 = vmatprep.mubr.msk.bf16.mxu1 %vm150_vm1, %v624_v13 }
  0x1e   :  { %581 = vmatmul.mubr.msk.bf16.gmra.mxu0 %vm150_vm1, %v625_v14  ;;  %597 = vmatmul.mubr.msk.bf16.gmra.mxu1 %vm150_vm1, %v626_v15 }
  0x1f   :  { %584 = vmatprep.mubr.msk.bf16.mxu0 %vm150_vm1, %v627_v16  ;;  %600 = vmatprep.mubr.msk.bf16.mxu1 %vm150_vm1, %v628_v17 }
  0x26   :  { %585 = vmatmul.mubr.msk.bf16.gmra.mxu0 %vm150_vm1, %v629_v18  ;;  %601 = vmatmul.mubr.msk.bf16.gmra.mxu1 %vm150_vm1, %v630_v19 }
  0xce   :  { %v574_v21 = vpop.f32.mrf.mxu0  ;;  %v590_v23 = vpop.f32.mrf.mxu1 }
  0xcf   :  { %v373_v24 = vmul.f32 %v574_v21, %v732_v20  ;;  %v389_v25 = vmul.f32 %v590_v23, %v732_v20 }
  0xd0   :  { %v237_v26 = vpop.f32.mrf.mxu0  ;;  %v301_v27 = vpop.f32.mrf.mxu1 }
  0xd1   :  { %v412_v28 = vadd.f32 %v737_v22, %v373_v24  ;;  %v428_v29 = vadd.f32 %v737_v22, %v389_v25  ;;  %v371_v30 = vmul.f32 %v732_v20, %v237_v26  ;;  %v387_v31 = vmul.f32 %v732_v20, %v301_v27 }
  0xd2   :  { %v575_v32 = vpop.f32.mrf.mxu0  ;;  %v591_v33 = vpop.f32.mrf.mxu1 }
  0xd3   :  { %v444_v34 = vmax.f32 %v412_v28, 0.0  ;;  %v460_v35 = vmax.f32 %v428_v29, 0.0  ;;  %v410_v36 = vadd.f32 %v737_v22, %v371_v30  ;;  %v426_v37 = vadd.f32 %v737_v22, %v387_v31 }
  0xd4   :  { %v374_v38 = vmul.f32 %v575_v32, %v732_v20  ;;  %v390_v39 = vmul.f32 %v591_v33, %v732_v20  ;;  %v240_v40 = vpop.f32.mrf.mxu0  ;;  %v304_v41 = vpop.f32.mrf.mxu1 }
  0xd5   :  { %476 = vst [vmem:[%s903_s4 + $0x10] sm:$0xff] %v444_v34  ;;  %492 = vst [vmem:[%s903_s4 + $0x90] sm:$0xff] %v460_v35  ;;  %v442_v42 = vmax.f32 %v410_v36, 0.0  ;;  %v458_v43 = vmax.f32 %v426_v37, 0.0  ;;  %v372_v44 = vmul.f32 %v732_v20, %v240_v40  ;;  %v388_v45 = vmul.f32 %v732_v20, %v304_v41 }
  0xd6   :  { %v413_v46 = vadd.f32 %v737_v22, %v374_v38  ;;  %v429_v47 = vadd.f32 %v737_v22, %v390_v39  ;;  %v578_v48 = vpop.f32.mrf.mxu0  ;;  %v594_v49 = vpop.f32.mrf.mxu1 }
  0xd7   :  { %474 = vst [vmem:[%s903_s4] sm:$0xff] %v442_v42  ;;  %490 = vst [vmem:[%s903_s4 + $0x80] sm:$0xff] %v458_v43  ;;  %v411_v50 = vadd.f32 %v737_v22, %v372_v44  ;;  %v427_v51 = vadd.f32 %v737_v22, %v388_v45  ;;  %v377_v52 = vmul.f32 %v578_v48, %v732_v20 }
  0xd8   :  { %v393_v53 = vmul.f32 %v594_v49, %v732_v20  ;;  %v445_v54 = vmax.f32 %v413_v46, 0.0  ;;  %v461_v55 = vmax.f32 %v429_v47, 0.0  ;;  %v253_v56 = vpop.f32.mrf.mxu0  ;;  %v317_v57 = vpop.f32.mrf.mxu1 }
  0xd9   :  { %v443_v58 = vmax.f32 %v411_v50, 0.0  ;;  %v459_v59 = vmax.f32 %v427_v51, 0.0  ;;  %v416_v60 = vadd.f32 %v737_v22, %v377_v52  ;;  %v375_v62 = vmul.f32 %v732_v20, %v253_v56 }
  0xda   :  { %v432_v61 = vadd.f32 %v737_v22, %v393_v53  ;;  %477 = vst [vmem:[%s903_s4 + $0x18] sm:$0xff] %v445_v54  ;;  %493 = vst [vmem:[%s903_s4 + $0x98] sm:$0xff] %v461_v55  ;;  %v391_v63 = vmul.f32 %v732_v20, %v317_v57  ;;  %v579_v0 = vpop.f32.mrf.mxu0  ;;  %v595_v1 = vpop.f32.mrf.mxu1 }
  0xdb   :  { %475 = vst [vmem:[%s903_s4 + $0x8] sm:$0xff] %v443_v58  ;;  %491 = vst [vmem:[%s903_s4 + $0x88] sm:$0xff] %v459_v59  ;;  %v448_v2 = vmax.f32 %v416_v60, 0.0  ;;  %v378_v4 = vmul.f32 %v579_v0, %v732_v20  ;;  %v394_v5 = vmul.f32 %v595_v1, %v732_v20  ;;  %v414_v6 = vadd.f32 %v737_v22, %v375_v62 }
  0xdc   :  { %v464_v3 = vmax.f32 %v432_v61, 0.0  ;;  %v430_v7 = vadd.f32 %v737_v22, %v391_v63  ;;  %v256_v8 = vpop.f32.mrf.mxu0  ;;  %v320_v9 = vpop.f32.mrf.mxu1 }
  0xdd   :  { %480 = vst [vmem:[%s903_s4 + $0x30] sm:$0xff] %v448_v2  ;;  %v417_v10 = vadd.f32 %v737_v22, %v378_v4  ;;  %v433_v11 = vadd.f32 %v737_v22, %v394_v5  ;;  %v376_v12 = vmul.f32 %v732_v20, %v256_v8  ;;  %v392_v13 = vmul.f32 %v732_v20, %v320_v9 }
  0xde   :  { %496 = vst [vmem:[%s903_s4 + $0xb0] sm:$0xff] %v464_v3  ;;  %v446_v14 = vmax.f32 %v414_v6, 0.0  ;;  %v462_v15 = vmax.f32 %v430_v7, 0.0  ;;  %v582_v16 = vpop.f32.mrf.mxu0  ;;  %v598_v17 = vpop.f32.mrf.mxu1 }
  0xdf   :  { %v449_v18 = vmax.f32 %v417_v10, 0.0  ;;  %v465_v19 = vmax.f32 %v433_v11, 0.0  ;;  %v415_v21 = vadd.f32 %v737_v22, %v376_v12  ;;  %v431_v23 = vadd.f32 %v737_v22, %v392_v13 }
  0xe0   :  { %478 = vst [vmem:[%s903_s4 + $0x20] sm:$0xff] %v446_v14  ;;  %494 = vst [vmem:[%s903_s4 + $0xa0] sm:$0xff] %v462_v15  ;;  %v381_v24 = vmul.f32 %v582_v16, %v732_v20  ;;  %v397_v25 = vmul.f32 %v598_v17, %v732_v20  ;;  %v269_v26 = vpop.f32.mrf.mxu0  ;;  %v333_v27 = vpop.f32.mrf.mxu1 }
  0xe1   :  { %481 = vst [vmem:[%s903_s4 + $0x38] sm:$0xff] %v449_v18  ;;  %497 = vst [vmem:[%s903_s4 + $0xb8] sm:$0xff] %v465_v19  ;;  %v447_v28 = vmax.f32 %v415_v21, 0.0  ;;  %v463_v29 = vmax.f32 %v431_v23, 0.0  ;;  %v379_v30 = vmul.f32 %v732_v20, %v269_v26  ;;  %v395_v31 = vmul.f32 %v732_v20, %v333_v27 }
  0xe2   :  { %v420_v32 = vadd.f32 %v737_v22, %v381_v24  ;;  %v436_v33 = vadd.f32 %v737_v22, %v397_v25  ;;  %v583_v34 = vpop.f32.mrf.mxu0  ;;  %v599_v35 = vpop.f32.mrf.mxu1 }
  0xe3   :  { %479 = vst [vmem:[%s903_s4 + $0x28] sm:$0xff] %v447_v28  ;;  %495 = vst [vmem:[%s903_s4 + $0xa8] sm:$0xff] %v463_v29  ;;  %v418_v36 = vadd.f32 %v737_v22, %v379_v30  ;;  %v434_v37 = vadd.f32 %v737_v22, %v395_v31  ;;  %v382_v38 = vmul.f32 %v583_v34, %v732_v20 }
  0xe4   :  { %v398_v39 = vmul.f32 %v599_v35, %v732_v20  ;;  %v452_v40 = vmax.f32 %v420_v32, 0.0  ;;  %v468_v41 = vmax.f32 %v436_v33, 0.0  ;;  %v272_v42 = vpop.f32.mrf.mxu0  ;;  %v336_v43 = vpop.f32.mrf.mxu1 }
  0xe5   :  { %v450_v44 = vmax.f32 %v418_v36, 0.0  ;;  %v466_v45 = vmax.f32 %v434_v37, 0.0  ;;  %v421_v46 = vadd.f32 %v737_v22, %v382_v38  ;;  %v380_v48 = vmul.f32 %v732_v20, %v272_v42 }
  0xe6   :  { %v437_v47 = vadd.f32 %v737_v22, %v398_v39  ;;  %484 = vst [vmem:[%s903_s4 + $0x50] sm:$0xff] %v452_v40  ;;  %500 = vst [vmem:[%s903_s4 + $0xd0] sm:$0xff] %v468_v41  ;;  %v396_v49 = vmul.f32 %v732_v20, %v336_v43  ;;  %v586_v50 = vpop.f32.mrf.mxu0  ;;  %v602_v51 = vpop.f32.mrf.mxu1 }
  0xe7   :  { %482 = vst [vmem:[%s903_s4 + $0x40] sm:$0xff] %v450_v44  ;;  %498 = vst [vmem:[%s903_s4 + $0xc0] sm:$0xff] %v466_v45  ;;  %v453_v52 = vmax.f32 %v421_v46, 0.0  ;;  %v385_v54 = vmul.f32 %v586_v50, %v732_v20  ;;  %v401_v55 = vmul.f32 %v602_v51, %v732_v20  ;;  %v419_v56 = vadd.f32 %v737_v22, %v380_v48 }
  0xe8   :  { %v469_v53 = vmax.f32 %v437_v47, 0.0  ;;  %v435_v57 = vadd.f32 %v737_v22, %v396_v49  ;;  %v285_v58 = vpop.f32.mrf.mxu0  ;;  %v349_v59 = vpop.f32.mrf.mxu1 }
  0xe9   :  { %485 = vst [vmem:[%s903_s4 + $0x58] sm:$0xff] %v453_v52  ;;  %v424_v60 = vadd.f32 %v737_v22, %v385_v54  ;;  %v440_v61 = vadd.f32 %v737_v22, %v401_v55  ;;  %v383_v62 = vmul.f32 %v732_v20, %v285_v58  ;;  %v399_v63 = vmul.f32 %v732_v20, %v349_v59 }
  0xea   :  { %501 = vst [vmem:[%s903_s4 + $0xd8] sm:$0xff] %v469_v53  ;;  %v451_v0 = vmax.f32 %v419_v56, 0.0  ;;  %v467_v1 = vmax.f32 %v435_v57, 0.0  ;;  %v587_v2 = vpop.f32.mrf.mxu0  ;;  %v603_v3 = vpop.f32.mrf.mxu1 }
  0xeb   :  { %v456_v4 = vmax.f32 %v424_v60, 0.0  ;;  %v472_v5 = vmax.f32 %v440_v61, 0.0  ;;  %v422_v6 = vadd.f32 %v737_v22, %v383_v62  ;;  %v438_v7 = vadd.f32 %v737_v22, %v399_v63 }
  0xec   :  { %483 = vst [vmem:[%s903_s4 + $0x48] sm:$0xff] %v451_v0  ;;  %499 = vst [vmem:[%s903_s4 + $0xc8] sm:$0xff] %v467_v1  ;;  %v386_v8 = vmul.f32 %v587_v2, %v732_v20  ;;  %v402_v9 = vmul.f32 %v603_v3, %v732_v20  ;;  %v288_v10 = vpop.f32.mrf.mxu0  ;;  %v352_v11 = vpop.f32.mrf.mxu1 }
  0xed   :  { %488 = vst [vmem:[%s903_s4 + $0x70] sm:$0xff] %v456_v4  ;;  %504 = vst [vmem:[%s903_s4 + $0xf0] sm:$0xff] %v472_v5  ;;  %v454_v12 = vmax.f32 %v422_v6, 0.0  ;;  %v470_v13 = vmax.f32 %v438_v7, 0.0  ;;  %v384_v14 = vmul.f32 %v732_v20, %v288_v10  ;;  %v400_v15 = vmul.f32 %v732_v20, %v352_v11 }
  0xee   :  { %v425_v16 = vadd.f32 %v737_v22, %v386_v8  ;;  %v441_v17 = vadd.f32 %v737_v22, %v402_v9 }
  0xef   :  { %486 = vst [vmem:[%s903_s4 + $0x60] sm:$0xff] %v454_v12  ;;  %502 = vst [vmem:[%s903_s4 + $0xe0] sm:$0xff] %v470_v13  ;;  %v423_v18 = vadd.f32 %v737_v22, %v384_v14  ;;  %v439_v19 = vadd.f32 %v737_v22, %v400_v15 }
  0xf0   :  { %v457_v21 = vmax.f32 %v425_v16, 0.0  ;;  %v473_v23 = vmax.f32 %v441_v17, 0.0 }
  0xf1   :  { %v455_v24 = vmax.f32 %v423_v18, 0.0  ;;  %v471_v20 = vmax.f32 %v439_v19, 0.0 }
  0xf2   :  { %489 = vst [vmem:[%s903_s4 + $0x78] sm:$0xff] %v457_v21  ;;  %505 = vst [vmem:[%s903_s4 + $0xf8] sm:$0xff] %v473_v23 }
  0xf3   :  { %487 = vst [vmem:[%s903_s4 + $0x68] sm:$0xff] %v455_v24  ;;  %503 = vst [vmem:[%s903_s4 + $0xe8] sm:$0xff] %v471_v20 }

// kernel: encoder_forward.2
= control target key start
LH: loop header
LB: loop body
LE: loop exit
PB: predicated region body
PF: predicated region fallthrough
CT: control target
= control target key end

     0   :  { %vm193_vm0 = vcmask 1041408   ;;  %vm144_vm1 = vcmask 293888   ;;  %v591_v20 = vmov 0.0   ;;  %s709_s1 = inlined_call_operand.vmem [shape: bf16[36,128], index: 1, kind: input, shape index: {}]   ;;  %s710_s0 = inlined_call_operand.vmem [shape: bf16[256,36], index: 0, kind: input, shape index: {}]   ;;  %s711_s2 = inlined_call_operand.vmem [shape: f32[8,128], index: 2, kind: output, shape index: {}]  }
   0x1   :  { %v572_v0 = vld [vmem:[%s709_s1 + $0x10] ss:$0 sps:$4 sm:$0x33]   ;;  %v573_v1 = vld [vmem:[%s709_s1 + $0x8] sm:$0xff]   ;;  %v575_v3 = vld [vmem:[%s710_s0] sm:$0xff]  }
   0x2   :  { %569 = vmatprep.subr.msk.bf16.mxu0 %vm193_vm0, %v572_v0  ;;  %v195_v2 = vsel %vm193_vm0, %v572_v0, 0  ;;  %570 = vmatprep.subr.msk.bf16.mxu1 %vm193_vm0, %v572_v0  ;;  %v574_v4 = vld [vmem:[%s709_s1] sm:$0xff]   ;;  %v576_v5 = vld [vmem:[%s710_s0 + $0x8] sm:$0xff]   ;;  %v577_v6 = vld [vmem:[%s710_s0 + $0x10] sm:$0xff]   ;;  %466 = vst [vmem:[%s711_s2 + $0x2] sm:$0x3f] %v591_v20 }
   0x3   :  { %526 = vmatpush3.bf16.msra.mxu0 %v195_v2  ;;  %566 = vmatpush3.bf16.msra.mxu1 %v195_v2  ;;  %v583_v7 = vld [vmem:[%s710_s0 + $0x40] sm:$0xff]   ;;  %v584_v8 = vld [vmem:[%s710_s0 + $0x48] sm:$0xff]   ;;  %v585_v9 = vld [vmem:[%s710_s0 + $0x50] sm:$0xff]  }
   0x4   :  { %527 = vmatprep.subr.bf16.mxu0 %v573_v1  ;;  %564 = vmatprep.subr.bf16.mxu1 %v573_v1  ;;  %v578_v10 = vld [vmem:[%s710_s0 + $0x18] sm:$0xff]   ;;  %v579_v12 = vld [vmem:[%s710_s0 + $0x20] sm:$0xff]   ;;  %v580_v14 = vld [vmem:[%s710_s0 + $0x28] sm:$0xff]  }
   0x5   :  { %531 = vmatprep.mubr.msk.bf16.mxu0 %vm144_vm1, %v575_v3  ;;  %547 = vmatprep.mubr.msk.bf16.mxu1 %vm144_vm1, %v583_v7  ;;  %v586_v11 = vld [vmem:[%s710_s0 + $0x58] sm:$0xff]   ;;  %v587_v13 = vld [vmem:[%s710_s0 + $0x60] sm:$0xff]   ;;  %v588_v15 = vld [vmem:[%s710_s0 + $0x68] sm:$0xff]  }
   0x6   :  { %v581_v16 = vld [vmem:[%s710_s0 + $0x30] sm:$0xff]   ;;  %v582_v18 = vld [vmem:[%s710_s0 + $0x38] sm:$0xff]  }
   0x7   :  { %528 = vmatpush3.bf16.msra.mxu0 %v573_v1  ;;  %567 = vmatpush3.bf16.msra.mxu1 %v573_v1  ;;  %v589_v17 = vld [vmem:[%s710_s0 + $0x70] sm:$0xff]   ;;  %v590_v19 = vld [vmem:[%s710_s0 + $0x78] sm:$0xff]  }
   0x8   :  { %529 = vmatprep.subr.bf16.mxu0 %v574_v4  ;;  %565 = vmatprep.subr.bf16.mxu1 %v574_v4 }
   0xb   :  { %530 = vmatpush3.bf16.msra.mxu0 %v574_v4  ;;  %568 = vmatpush3.bf16.msra.mxu1 %v574_v4 }
   0xe   :  { %532 = vmatmul.mubr.msk.bf16.vlgmr.msra.gmra.mxu0 %vm144_vm1, %v576_v5  ;;  %548 = vmatmul.mubr.msk.bf16.vlgmr.msra.gmra.mxu1 %vm144_vm1, %v584_v8 }
   0xf   :  { %535 = vmatprep.mubr.msk.bf16.mxu0 %vm144_vm1, %v577_v6  ;;  %551 = vmatprep.mubr.msk.bf16.mxu1 %vm144_vm1, %v585_v9 }
  0x16   :  { %536 = vmatmul.mubr.msk.bf16.gmra.mxu0 %vm144_vm1, %v578_v10  ;;  %552 = vmatmul.mubr.msk.bf16.gmra.mxu1 %vm144_vm1, %v586_v11 }
  0x17   :  { %539 = vmatprep.mubr.msk.bf16.mxu0 %vm144_vm1, %v579_v12  ;;  %555 = vmatprep.mubr.msk.bf16.mxu1 %vm144_vm1, %v587_v13 }
  0x1e   :  { %540 = vmatmul.mubr.msk.bf16.gmra.mxu0 %vm144_vm1, %v580_v14  ;;  %556 = vmatmul.mubr.msk.bf16.gmra.mxu1 %vm144_vm1, %v588_v15 }
  0x1f   :  { %543 = vmatprep.mubr.msk.bf16.mxu0 %vm144_vm1, %v581_v16  ;;  %559 = vmatprep.mubr.msk.bf16.mxu1 %vm144_vm1, %v589_v17 }
  0x26   :  { %544 = vmatmul.mubr.msk.bf16.gmra.mxu0 %vm144_vm1, %v582_v18  ;;  %560 = vmatmul.mubr.msk.bf16.gmra.mxu1 %vm144_vm1, %v590_v19 }
  0xce   :  { %v533_v21 = vpop.f32.mrf.mxu0  ;;  %v683_v22 = vpop.f32.mrf.mxu1 }
  0xcf   :  { %v398_v32 = vmul.f32 %v533_v21, %v533_v21 }
  0xd0   :  { %v231_v23 = vpop.f32.mrf.mxu0  ;;  %v685_v25 = vpop.f32.mrf.mxu1 }
  0xd1   :  { %v396_v27 = vmul.f32 %v231_v23, %v231_v23 }
  0xd2   :  { %v534_v24 = vpop.f32.mrf.mxu0  ;;  %v687_v31 = vpop.f32.mrf.mxu1 }
  0xd3   :  { %v399_v36 = vmul.f32 %v534_v24, %v534_v24 }
  0xd4   :  { %v234_v26 = vpop.f32.mrf.mxu0  ;;  %v298_v40 = vpop.f32.mrf.mxu1 }
  0xd5   :  { %v358_v28 = vadd.f32 %v234_v26, %v231_v23  ;;  %v397_v29 = vmul.f32 %v234_v26, %v234_v26 }
  0xd6   :  { %v537_v30 = vpop.f32.mrf.mxu0  ;;  %v689_v49 = vpop.f32.mrf.mxu1 }
  0xd7   :  { %v359_v33 = vadd.f32 %v533_v21, %v358_v28  ;;  %v428_v34 = vadd.f32 %v397_v29, %v396_v27  ;;  %v402_v50 = vmul.f32 %v537_v30, %v537_v30 }
  0xd8   :  { %v247_v35 = vpop.f32.mrf.mxu0  ;;  %v311_v58 = vpop.f32.mrf.mxu1 }
  0xd9   :  { %v429_v37 = vadd.f32 %v428_v34, %v398_v32  ;;  %v360_v38 = vadd.f32 %v534_v24, %v359_v33  ;;  %v400_v42 = vmul.f32 %v247_v35, %v247_v35 }
  0xda   :  { %v538_v39 = vpop.f32.mrf.mxu0  ;;  %v554_v3 = vpop.f32.mrf.mxu1 }
  0xdb   :  { %v361_v41 = vadd.f32 %v360_v38, %v247_v35  ;;  %v430_v43 = vadd.f32 %v429_v37, %v399_v36  ;;  %v403_v54 = vmul.f32 %v538_v39, %v538_v39  ;;  %v413_v35 = vmul.f32 %v298_v40, %v298_v40 }
  0xdc   :  { %v250_v44 = vpop.f32.mrf.mxu0  ;;  %v314_v12 = vpop.f32.mrf.mxu1  ;;  %v414_v38 = vmul.f32 %v683_v22, %v683_v22 }
  0xdd   :  { %v431_v45 = vadd.f32 %v430_v43, %v400_v42  ;;  %v362_v46 = vadd.f32 %v361_v41, %v250_v44  ;;  %v401_v47 = vmul.f32 %v250_v44, %v250_v44  ;;  %v415_v42 = vmul.f32 %v687_v31, %v687_v31 }
  0xde   :  { %v541_v48 = vpop.f32.mrf.mxu0  ;;  %v557_v20 = vpop.f32.mrf.mxu1 }
  0xdf   :  { %v363_v51 = vadd.f32 %v537_v30, %v362_v46  ;;  %v432_v52 = vadd.f32 %v431_v45, %v401_v47  ;;  %v406_v4 = vmul.f32 %v541_v48, %v541_v48  ;;  %v412_v30 = vmul.f32 %v685_v25, %v685_v25 }
  0xe0   :  { %v263_v53 = vpop.f32.mrf.mxu0  ;;  %v327_v29 = vpop.f32.mrf.mxu1  ;;  %v416_v47 = vmul.f32 %v311_v58, %v311_v58 }
  0xe1   :  { %v433_v55 = vadd.f32 %v432_v52, %v402_v50  ;;  %v364_v56 = vadd.f32 %v538_v39, %v363_v51  ;;  %v404_v60 = vmul.f32 %v263_v53, %v263_v53  ;;  %v417_v50 = vmul.f32 %v314_v12, %v314_v12 }
  0xe2   :  { %v542_v57 = vpop.f32.mrf.mxu0  ;;  %v558_v37 = vpop.f32.mrf.mxu1  ;;  %v418_v52 = vmul.f32 %v689_v49, %v689_v49 }
  0xe3   :  { %v365_v59 = vadd.f32 %v364_v56, %v263_v53  ;;  %v434_v61 = vadd.f32 %v433_v55, %v403_v54  ;;  %v407_v8 = vmul.f32 %v542_v57, %v542_v57  ;;  %v419_v54 = vmul.f32 %v554_v3, %v554_v3 }
  0xe4   :  { %v266_v62 = vpop.f32.mrf.mxu0  ;;  %v330_v45 = vpop.f32.mrf.mxu1 }
  0xe5   :  { %v435_v63 = vadd.f32 %v434_v61, %v404_v60  ;;  %v366_v0 = vadd.f32 %v365_v59, %v266_v62  ;;  %v405_v1 = vmul.f32 %v266_v62, %v266_v62  ;;  %v421_v62 = vmul.f32 %v330_v45, %v330_v45 }
  0xe6   :  { %v545_v2 = vpop.f32.mrf.mxu0  ;;  %v561_v51 = vpop.f32.mrf.mxu1 }
  0xe7   :  { %v367_v5 = vadd.f32 %v541_v48, %v366_v0  ;;  %v436_v6 = vadd.f32 %v435_v63, %v405_v1  ;;  %v410_v21 = vmul.f32 %v545_v2, %v545_v2  ;;  %v422_v0 = vmul.f32 %v557_v20, %v557_v20 }
  0xe8   :  { %v279_v7 = vpop.f32.mrf.mxu0 }
  0xe9   :  { %v437_v9 = vadd.f32 %v436_v6, %v406_v4  ;;  %v368_v10 = vadd.f32 %v542_v57, %v367_v5  ;;  %v408_v14 = vmul.f32 %v279_v7, %v279_v7  ;;  %v343_v57 = vpop.f32.mrf.mxu1  ;;  %v423_v4 = vmul.f32 %v558_v37, %v558_v37 }
  0xea   :  { %v546_v11 = vpop.f32.mrf.mxu0 }
  0xeb   :  { %v369_v13 = vadd.f32 %v368_v10, %v279_v7  ;;  %v438_v15 = vadd.f32 %v437_v9, %v407_v8  ;;  %v411_v26 = vmul.f32 %v546_v11, %v546_v11  ;;  %v562_v63 = vpop.f32.mrf.mxu1  ;;  %v424_v8 = vmul.f32 %v343_v57, %v343_v57 }
  0xec   :  { %v282_v16 = vpop.f32.mrf.mxu0 }
  0xed   :  { %v439_v17 = vadd.f32 %v438_v15, %v408_v14  ;;  %v370_v18 = vadd.f32 %v369_v13, %v282_v16  ;;  %v409_v19 = vmul.f32 %v282_v16, %v282_v16  ;;  %v346_v7 = vpop.f32.mrf.mxu1  ;;  %v427_v15 = vmul.f32 %v562_v63, %v562_v63 }
  0xef   :  { %v371_v23 = vadd.f32 %v545_v2, %v370_v18  ;;  %v440_v24 = vadd.f32 %v439_v17, %v409_v19 }
  0xf1   :  { %v372_v27 = vadd.f32 %v546_v11, %v371_v23  ;;  %v441_v28 = vadd.f32 %v440_v24, %v410_v21  ;;  %v425_v11 = vmul.f32 %v346_v7, %v346_v7 }
  0xf3   :  { %v442_v32 = vadd.f32 %v441_v28, %v411_v26  ;;  %v373_v33 = vadd.f32 %v372_v27, %v685_v25 }
  0xf5   :  { %v374_v34 = vadd.f32 %v373_v33, %v298_v40  ;;  %v443_v36 = vadd.f32 %v442_v32, %v412_v30 }
  0xf7   :  { %v375_v39 = vadd.f32 %v683_v22, %v374_v34  ;;  %v444_v41 = vadd.f32 %v443_v36, %v413_v35 }
  0xf9   :  { %v445_v43 = vadd.f32 %v444_v41, %v414_v38  ;;  %v376_v44 = vadd.f32 %v687_v31, %v375_v39  ;;  %v420_v31 = vmul.f32 %v327_v29, %v327_v29 }
  0xfb   :  { %v377_v46 = vadd.f32 %v376_v44, %v311_v58  ;;  %v446_v25 = vadd.f32 %v445_v43, %v415_v42 }
  0xfd   :  { %v447_v48 = vadd.f32 %v446_v25, %v416_v47  ;;  %v378_v40 = vadd.f32 %v377_v46, %v314_v12  ;;  %v426_v12 = vmul.f32 %v561_v51, %v561_v51 }
  0xff   :  { %v379_v22 = vadd.f32 %v689_v49, %v378_v40  ;;  %v448_v53 = vadd.f32 %v447_v48, %v417_v50 }
 0x101   :  { %v449_v55 = vadd.f32 %v448_v53, %v418_v52  ;;  %v380_v56 = vadd.f32 %v554_v3, %v379_v22 }
 0x103   :  { %v381_v59 = vadd.f32 %v380_v56, %v327_v29  ;;  %v450_v60 = vadd.f32 %v449_v55, %v419_v54 }
 0x105   :  { %v451_v61 = vadd.f32 %v450_v60, %v420_v31  ;;  %v382_v58 = vadd.f32 %v381_v59, %v330_v45 }
 0x107   :  { %v383_v1 = vadd.f32 %v557_v20, %v382_v58  ;;  %v452_v2 = vadd.f32 %v451_v61, %v421_v62 }
 0x109   :  { %v453_v5 = vadd.f32 %v452_v2, %v422_v0  ;;  %v384_v6 = vadd.f32 %v558_v37, %v383_v1 }
 0x10b   :  { %v385_v49 = vadd.f32 %v384_v6, %v343_v57  ;;  %v454_v9 = vadd.f32 %v453_v5, %v423_v4 }
 0x10d   :  { %v455_v10 = vadd.f32 %v454_v9, %v424_v8  ;;  %v386_v3 = vadd.f32 %v385_v49, %v346_v7 }
 0x10f   :  { %v387_v13 = vadd.f32 %v561_v51, %v386_v3  ;;  %v456_v14 = vadd.f32 %v455_v10, %v425_v11 }
 0x111   :  { %v388_v16 = vadd.f32 %v562_v63, %v387_v13  ;;  %v457_v17 = vadd.f32 %v456_v14, %v426_v12 }
 0x113   :  { %v389_v18 = vrot.slane %v388_v16, 4  ;;  %v458_v19 = vadd.f32 %v457_v17, %v427_v15 }
 0x115   :  { %v390_v20 = vadd.f32 %v389_v18, %v388_v16  ;;  %v459_v21 = vrot.slane %v458_v19, 4 }
 0x117   :  { %v391_v23 = vrot.slane %v390_v20, 2  ;;  %v460_v24 = vadd.f32 %v459_v21, %v458_v19 }
 0x119   :  { %v392_v26 = vadd.f32 %v391_v23, %v390_v20  ;;  %v461_v27 = vrot.slane %v460_v24, 2 }
 0x11b   :  { %v393_v28 = vrot.slane %v392_v26, 1  ;;  %v462_v29 = vadd.f32 %v461_v27, %v460_v24 }
 0x11d   :  { %v394_v30 = vadd.f32 %v393_v28, %v392_v26  ;;  %v463_v32 = vrot.slane %v462_v29, 1 }
 0x11f   :  { %395 = vst [vmem:[%s711_s2] sm:$0x1] %v394_v30  ;;  %v464_v33 = vadd.f32 %v463_v32, %v462_v29 }
 0x121   :  { %465 = vst [vmem:[%s711_s2 + $0x1] sm:$0x1] %v464_v33 }

</bundles_post_ra>
